<compile_context>
chip_gen: v5e
topology: v5e:2x2
jax: 0.10.0
libtpu: 0.0.40
codegen_flags: <defaults>
</compile_context>

<pallas_src>
import jax
import jax.numpy as jnp
from jax.experimental import pallas as pl
from jax.experimental.pallas import tpu as pltpu


# Conservative budget for keeping the whole table resident in VMEM.  Chosen so
# that even with double-buffered blocks it fits v7x's 64 MiB VMEM; v5e/v6e
# (128 MiB) have plenty of headroom.
_TABLE_VMEM_BUDGET = 24 * 1024 * 1024
_HBM_DMAS_IN_FLIGHT = 16  # fallback path: number of outstanding row DMAs


def _embed_gather_vmem_kernel(ids_ref, tab_ref, out_ref):
    """Gather T rows from a VMEM-resident table.

    ids_ref : (n_pad,) int32 scalar-prefetch ref in SMEM (token ids)
    tab_ref : (V, D) embedding table, resident in VMEM across the grid
    out_ref : (T, D) output tile for this grid step
    """
    T = out_ref.shape[0]
    base = pl.program_id(0) * T

    @pl.loop(0, T)
    def _gather(j):
        tok = ids_ref[base + j]
        out_ref[pl.ds(j, 1), :] = tab_ref[pl.ds(tok, 1), :]


def _embed_gather_hbm_kernel(ids_ref, tab_hbm_ref, out_ref, rows_vmem, sems):
    """Fallback for tables too large for VMEM: pipelined row DMAs from HBM.

    ids_ref     : (n_pad,) int32 scalar-prefetch ref in SMEM
    tab_hbm_ref : (V, D) table left in HBM (memory_space=pl.ANY)
    out_ref     : (T, D) output tile for this grid step
    rows_vmem   : (NS, 1, D) VMEM landing buffers (one per in-flight DMA)
    sems        : (NS,) DMA semaphores
    """
    T = out_ref.shape[0]
    base = pl.program_id(0) * T
    NS = sems.shape[0]

    def _start(j):
        tok = ids_ref[base + j]
        slot = j % NS
        pltpu.make_async_copy(
            tab_hbm_ref.at[pl.ds(tok, 1), :],
            rows_vmem.at[slot],
            sems.at[slot],
        ).start()

    # Prime the pipeline with up to NS outstanding row fetches.
    @pl.loop(0, min(NS, T))
    def _prime(j):
        _start(j)

    @pl.loop(0, T)
    def _step(j):
        slot = j % NS
        # Wait for row j (dummy src index; the wait only consumes the sem).
        pltpu.make_async_copy(
            tab_hbm_ref.at[pl.ds(0, 1), :],
            rows_vmem.at[slot],
            sems.at[slot],
        ).wait()
        out_ref[pl.ds(j, 1), :] = rows_vmem[slot]

        @pl.when(j + NS < T)
        def _():
            _start(j + NS)


def word_embedding_forward(x, table, *, tokens_per_step=512,
                           force_hbm_gather=False):
    """Embedding lookup (== WordEmbedding.forward in eval mode).

    x:     (B, S) int32 token ids in [0, ntoken]  (ntoken is the padding id)
    table: (ntoken+1, emb_dim) embedding table, row ntoken is all-zero
    returns (B, S, emb_dim) with the table's dtype
    """
    B, S = x.shape
    V, D = table.shape
    n = B * S

    # Tokens per grid step: multiple of 8 (sublane), 512 by default.
    T = int(tokens_per_step)
    if n < T:
        T = max(8, -(-n // 8) * 8)
    n_pad = -(-n // T) * T

    ids = x.reshape(n).astype(jnp.int32)
    if n_pad != n:
        ids = jnp.pad(ids, (0, n_pad - n))  # pad with id 0 (sliced off below)

    itemsize = jnp.dtype(table.dtype).itemsize
    table_bytes = V * D * itemsize
    out_tile_bytes = T * D * itemsize
    use_vmem_table = (not force_hbm_gather) and (table_bytes <= _TABLE_VMEM_BUDGET)

    if use_vmem_table:
        # Resident-table path: one big table DMA, in-VMEM gather.
        vmem_limit = min(
            60 << 20,
            max(16 << 20, 2 * table_bytes + 4 * out_tile_bytes + (2 << 20)),
        )
        out_flat = pl.pallas_call(
            _embed_gather_vmem_kernel,
            out_shape=jax.ShapeDtypeStruct((n_pad, D), table.dtype),
            grid_spec=pltpu.PrefetchScalarGridSpec(
                num_scalar_prefetch=1,              # ids land in SMEM first
                grid=(n_pad // T,),
                in_specs=[
                    # Full table as one block, constant across the grid
                    # (block shape == full array dims, so no (8,128) issue).
                    pl.BlockSpec((V, D), lambda i, ids_smem: (0, 0)),
                ],
                out_specs=pl.BlockSpec((T, D), lambda i, ids_smem: (i, 0)),
            ),
            compiler_params=pltpu.CompilerParams(
                dimension_semantics=("parallel",),   # independent rows: use both TCs on v7x
                vmem_limit_bytes=int(vmem_limit)),
        )(ids, table)
    else:
        # Large-table fallback: table stays in HBM, batched in-flight row DMAs.
        NS = _HBM_DMAS_IN_FLIGHT
        vmem_limit = min(
            60 << 20,
            max(16 << 20, 2 * out_tile_bytes + NS * 8 * D * itemsize + (4 << 20)),
        )
        out_flat = pl.pallas_call(
            _embed_gather_hbm_kernel,
            out_shape=jax.ShapeDtypeStruct((n_pad, D), table.dtype),
            grid_spec=pltpu.PrefetchScalarGridSpec(
                num_scalar_prefetch=1,
                grid=(n_pad // T,),
                in_specs=[pl.BlockSpec(memory_space=pl.ANY)],   # raw HBM ref
                out_specs=pl.BlockSpec((T, D), lambda i, ids_smem: (i, 0)),
                scratch_shapes=[
                    pltpu.VMEM((NS, 1, D), table.dtype),
                    pltpu.SemaphoreType.DMA((NS,)),
                ],
            ),
            compiler_params=pltpu.CompilerParams(
                dimension_semantics=("parallel",),
                vmem_limit_bytes=int(vmem_limit)),
        )(ids, table)

    out = out_flat[:n].reshape(B, S, D)
    # Dropout: identity in inference (eval) mode -- nothing to do.
    return out


if __name__ == "__main__":
    ntoken = 20
    emb_dim = 128
    B, S = 2, 8

    key = jax.random.PRNGKey(0)
    kw, kx = jax.random.split(key)

    # nn.Embedding(ntoken + 1, emb_dim, padding_idx=ntoken):
    # deterministic random init for real rows, zero row for the padding index.
    table = jax.random.normal(kw, (ntoken + 1, emb_dim), dtype=jnp.float32)
    table = table.at[ntoken].set(0.0)

    # token ids in [0, ntoken]; force one padding token to exercise that path
    x = jax.random.randint(kx, (B, S), 0, ntoken + 1, dtype=jnp.int32)
    x = x.at[0, -1].set(ntoken)

    ref = table[x]

    # Primary path: VMEM-resident table gather.
    out = jax.block_until_ready(word_embedding_forward(x, table))
    assert out.shape == (B, S, emb_dim)
    assert out.dtype == jnp.float32
    assert jnp.allclose(out, ref), "mismatch vs reference embedding lookup (VMEM path)"
    assert jnp.all(out[0, -1] == 0.0), "padding row must be zero (VMEM path)"

    # Fallback path (used when the table exceeds the VMEM budget): force it on
    # the same small inputs to verify it too.
    out_hbm = jax.block_until_ready(
        word_embedding_forward(x, table, force_hbm_gather=True))
    assert jnp.allclose(out_hbm, ref), "mismatch vs reference embedding lookup (HBM path)"
    assert jnp.all(out_hbm[0, -1] == 0.0), "padding row must be zero (HBM path)"

    print("KERNEL_OK")
</pallas_src>

<mosaic_0001>
module attributes {stable_mosaic.version = 11 : i64} {
  func.func @_embed_gather_vmem_kernel(%arg0: i32, %arg1: memref<16xi32, #tpu.memory_space<smem>>, %arg2: memref<21x128xf32, #tpu.memory_space<vmem>>, %arg3: memref<16x128xf32, #tpu.memory_space<vmem>>) attributes {dimension_semantics = [#tpu.dimension_semantics<parallel>], iteration_bounds = array<i64: 1>, scalar_prefetch = 1 : i64, scratch_operands = 0 : i64, tpu.core_type = #tpu.core_type<tc>, window_params = [{pipeline_mode = #tpu.pipeline_mode<synchronous>, transform_indices = @transform_0, window_bounds = array<i64: 21, 128>}, {transform_indices = @transform_1, window_bounds = array<i64: 16, 128>}]} {
    %c16_i32 = arith.constant 16 : i32
    %0 = arith.muli %arg0, %c16_i32 : i32
    %c0_i32 = arith.constant 0 : i32
    %c16_i32_0 = arith.constant 16 : i32
    %1 = arith.addi %c0_i32, %c16_i32_0 : i32
    %c1_i32 = arith.constant 1 : i32
    scf.for %arg4 = %c0_i32 to %1 step %c1_i32  : i32 {
      %c1_i32_2 = arith.constant 1 : i32
      %2 = arith.muli %arg4, %c1_i32_2 : i32
      %c0_i32_3 = arith.constant 0 : i32
      %3 = arith.addi %c0_i32_3, %2 : i32
      %4 = arith.addi %0, %3 : i32
      %5 = arith.index_cast %4 : i32 to index
      %6 = memref.load %arg1[%5] : memref<16xi32, #tpu.memory_space<smem>>
      %7 = arith.index_cast %6 : i32 to index
      %c0 = arith.constant 0 : index
      %8 = vector.load %arg2[%7, %c0] : memref<21x128xf32, #tpu.memory_space<vmem>>, vector<1x128xf32>
      %9 = arith.index_cast %3 : i32 to index
      %c0_4 = arith.constant 0 : index
      %10 = vector.load %arg3[%9, %c0_4] : memref<16x128xf32, #tpu.memory_space<vmem>>, vector<1x128xf32>
      tpu.vector_store %arg3[%9, %c0_4], %8 {strides = array<i32>} : memref<16x128xf32, #tpu.memory_space<vmem>>, vector<1x128xf32>,
    }
    %c16_i32_1 = arith.constant 16 : i32
    return
  }
  func.func @transform_0(%arg0: i32, %arg1: memref<16xi32, #tpu.memory_space<smem>>) -> (i32, i32) {
    %c0_i32 = arith.constant 0 : i32
    %c0_i32_0 = arith.constant 0 : i32
    %c0_i32_1 = arith.constant 0 : i32
    return %c0_i32, %c0_i32_0 : i32, i32
  }
  func.func @transform_1(%arg0: i32, %arg1: memref<16xi32, #tpu.memory_space<smem>>) -> (i32, i32) {
    %c0_i32 = arith.constant 0 : i32
    %c0_i32_0 = arith.constant 0 : i32
    return %arg0, %c0_i32 : i32, i32
  }
}

</mosaic_0001>

<bundles_post_ra>
// kernel: tpu_custom_call.1
= control target key start
LH: loop header
LB: loop body
LE: loop exit
PB: predicated region body
PF: predicated region fallthrough
CT: control target
= control target key end

     0   :  { %s160_s12 = smov [#allocation3]   ;;  %s189_s0 = inlined_call_operand.hbm [shape: s32[16], index: 0, kind: input, shape index: {}]   ;;  %s190_s1 = inlined_call_operand.hbm [shape: f32[21,128], index: 1, kind: input, shape index: {}]   ;;  %s191_s2 = inlined_call_operand.hbm [shape: f32[16,128], index: 2, kind: output, shape index: {}]  }
   0x1   :  { %s8_s11 = sshll.u32 %s189_s0, 4  ;;  %s9_s11 = int_to_ptr.hbm [resolvable:$true] %s8_s11 }
   0x2   :  { %11 = dma.hbm_to_smem %s9_s11, 16, %s160_s12, [#allocation2] }
   0x3   :  { %150 = dma.done.wait [#allocation2], 16 }
   0x4   :  { %151 = vsyncadd [#allocation2], 4294967280 }
   0x5   :  { %14 = sfence }
   0x6   :  { %15 = vsyncpa [#allocation5], 0 }
   0x7   :  { %16 = vsyncpa [#allocation6], 0  ;;  %s21_s15 = sshll.u32 %s190_s1, 4  ;;  %s161_s16 = smov [#allocation4]   ;;  %s22_s15 = int_to_ptr.hbm [resolvable:$true] %s21_s15 }
   0x8   :  { %s23_s17 = sshll.u32 %s161_s16, 4  ;;  %s162_s18 = smov 128   ;;  %s24_s17 = int_to_ptr.vmem [resolvable:$true] %s23_s17 }
   0x9   :  { %s163_s19 = smov 8  }
   0xa   :  { %29 = dma.hbm_to_vmem [thread:$0]  %s22_s15, 384, %s24_s17, [#allocation5], %s162_s18, %s162_s18, %s163_s19  }
   0xb   :  { %152 = dma.done.wait [#allocation5], 384  }
   0xc   :  { %153 = vsyncadd [#allocation5], 4294966912  ;;  %s156_s0 = smov 0  }
   0xd LB: > { %s42_s20 = sld [smem:[#allocation3 + %s158_s0]]  ;;  %s45_s22 = scalar_lea.vmem [#allocation7], %s158_s0  ;;  %s158_s0 = sphi %s156_s0, %s40_s0  }
   0xe   : > { %s40_s0 = sadd.s32 1, %s158_s0  }
   0xf   : > { %p37_p0 = scmp.ge.s32.totalorder %s40_s0, 16  }
  0x10   :  { %s53_s24 = sshll.u32 (%p37_p0), %s191_s2, 4  ;;  %s164_s25 = smov (%p37_p0), [#allocation7]   ;;  %s54_s24 = int_to_ptr.hbm [resolvable:$true] %s53_s24 }
  0x11   :  { %39 = sbr.rel (!%p37_p0) target bundleno = 13 (0xd), region = 37  ;;  %s51_s26 = sshll.u32 (%p37_p0), %s164_s25, 4  ;;  %s52_s26 = int_to_ptr.vmem [resolvable:$true] %s51_s26 }
  0x13   : > { %s43_s21 = scalar_lea.vmem [#allocation4], %s42_s20 }
  0x14   : > { %v44_v0 = vld [vmem:[%s43_s21] sm:$0x1] }
  0x15   : > { %46 = vst [vmem:[%s45_s22] sm:$0x1] %v44_v0 }
  0x16   :  { %59 = dma.vmem_to_hbm [thread:$0]  %s52_s26, 256, %s54_s24, [#allocation6], %s162_s18, %s162_s18, %s163_s19  }
  0x17   :  { %154 = dma.done.wait [#allocation6], 256  }
  0x18   :  { %155 = vsyncadd [#allocation6], 4294967040 }
  0x19   :  { %64 = vsyncpa [#allocation5], 1 }
  0x1a   :  { %65 = vsyncpa [#allocation6], 1 }

</bundles_post_ra>
